<compile_context>
chip_gen: v6e
topology: v6e:2x2x1
jax: 0.10.0
libtpu: 0.0.40
codegen_flags: <defaults>
</compile_context>

<pallas_src>
import functools

import jax
import jax.numpy as jnp
import numpy as np
from jax import lax
from jax.experimental import pallas as pl
from jax.experimental.pallas import tpu as pltpu


def _build_perm(w, gain, dtype):
    """Fused (w, w) 0/1 permutation: perm[k, s2*wo + j] = (k == j*gain + s2).

    Right-multiplying a (rows, w) tile by this matrix deinterleaves the lane
    dim with the output columns grouped by s2 (all s2=0 columns first, ...).
    """
    s = gain
    wo = w // s
    k = np.arange(w)[:, None]                        # (w, 1)
    col = np.arange(w)[None, :]                      # (1, w)
    s2 = col // wo
    j = col % wo
    perm_np = (k == j * s + s2).astype(np.float32)
    return jnp.asarray(perm_np, dtype=dtype)


def _contract_mxu_kernel(x_ref, perm_ref, o_ref, *, gain, compute_dtype,
                         precision):
    """x_ref: (cb*h, w)   perm_ref: (w, w)   o_ref: (s*s, cb*ho, wo)."""
    s = gain
    rows_total, w = x_ref.shape
    wo = w // s
    rows_out = rows_total // s                       # = cb * ho

    perm = perm_ref[...]                             # constant block, DMA'd once

    for s1 in range(s):
        # Sublane-strided read: rows ci*h + (hoi*s + s1) for all (ci, hoi).
        rows = x_ref[pl.ds(s1, rows_out, stride=s), :]           # (cb*ho, w)
        rows = rows.astype(compute_dtype)
        # One fat dot per s1 (N = w on the MXU); columns grouped by s2.
        # TODO(synk): try per-operand precision (HIGHEST lhs / DEFAULT rhs) or
        # a bf16x3 dot algorithm to halve the f32 MXU passes on wide layers.
        gathered = jnp.dot(rows, perm,
                           precision=precision,
                           preferred_element_type=jnp.float32)   # (cb*ho, w)
        for s2 in range(s):
            o_ref[s1 * s + s2] = (
                gathered[:, s2 * wo:(s2 + 1) * wo].astype(o_ref.dtype))


def _contract_relayout_kernel(x_ref, o_ref, *, gain, h):
    """Dtype-agnostic fallback (reshape+transpose relayout) for exotic dtypes."""
    s = gain
    rows_total, w = x_ref.shape
    cb = rows_total // h
    ho, wo = h // s, w // s
    y = x_ref[...].reshape(cb, ho, s, wo, s)
    y = jnp.transpose(y, (2, 4, 0, 1, 3))            # (s1, s2, cb, ho, wo)
    o_ref[...] = y.reshape(s * s, cb * ho, wo)


def _pick_channel_block(c, h, w, itemsize, gain, batch,
                        budget_bytes=6 * 1024 * 1024):
    """Largest channel-block divisor of c whose (cb*h, w) input tile fits
    `budget_bytes`, preferring dtype-aware sublane alignment, and keeping the
    parallel grid >= 2 steps when possible (v7x has 2 TensorCores)."""
    ho = h // gain
    # Rows per packed sublane group: 8 for 4-byte, 16 for bf16/f16, 32 for int8.
    packing = 8 * max(1, 4 // max(itemsize, 1))

    def legal(cb):
        # (8,128) rule on the sublane dims (lane dim is always the full width).
        return (((cb * h) % 8 == 0 or cb == c) and
                ((cb * ho) % 8 == 0 or cb == c))

    def aligned(cb):
        return (cb * h) % packing == 0 and (cb * ho) % packing == 0

    def tile_bytes(cb):
        return cb * h * w * itemsize

    divisors = [d for d in range(1, c + 1) if c % d == 0]
    legal_divs = [d for d in divisors if legal(d)] or [c]

    fit = [d for d in legal_divs if tile_bytes(d) <= budget_bytes]
    fit_aligned = [d for d in fit if aligned(d)]
    if fit_aligned:
        cb = max(fit_aligned)
    elif fit:
        cb = max(fit)
    else:
        cb = min(legal_divs)          # nothing fits the budget: smallest legal

    # Keep both v7x TensorCores busy: ensure >= 2 parallel grid steps if possible.
    if batch * (c // cb) < 2:
        multi = [d for d in legal_divs if c // d >= 2]
        if multi:
            multi_fit = [d for d in multi if tile_bytes(d) <= budget_bytes]
            cb = max(multi_fit) if multi_fit else max(multi)
    return cb


def contract(x: jax.Array, gain: int = 2) -> jax.Array:
    """Pallas implementation of Contract.forward for NCHW input."""
    b, c, h, w = x.shape
    s = gain
    assert h % s == 0 and w % s == 0, "spatial dims must be divisible by gain"
    ho, wo = h // s, w // s

    dt = jnp.dtype(x.dtype)
    itemsize = dt.itemsize

    # Dtype dispatch: pick the compute dtype that keeps the MXU gather exact.
    if dt == jnp.dtype(jnp.bfloat16):
        use_mxu, compute_dtype, precision = True, jnp.bfloat16, lax.Precision.DEFAULT
    elif dt in (jnp.dtype(jnp.float32), jnp.dtype(jnp.float16)):
        use_mxu, compute_dtype, precision = True, jnp.float32, lax.Precision.HIGHEST
    elif dt in (jnp.dtype(jnp.int8), jnp.dtype(jnp.uint8)):
        # 8-bit ints are exactly representable in bf16 -> exact on every gen.
        use_mxu, compute_dtype, precision = True, jnp.bfloat16, lax.Precision.DEFAULT
    else:
        # TODO(synk): wider integer dtypes take the slower relayout fallback.
        use_mxu, compute_dtype, precision = False, None, None

    cb = _pick_channel_block(c, h, w, itemsize, s, b)

    # VMEM plan: 2x input tile + 2x output tile (same bytes) + permutation
    # matrix + in-kernel temporaries; set vmem_limit_bytes from it and keep it
    # below v7x's 64 MiB physical VMEM (v5e/v6e have 128 MiB, so also safe).
    in_tile = cb * h * w * itemsize
    if use_mxu:
        cisize = jnp.dtype(compute_dtype).itemsize
        perm_bytes = w * w * cisize
        temp_bytes = cb * ho * w * (cisize + 4)      # strided rows + f32 result
    else:
        perm_bytes = 0
        temp_bytes = 2 * in_tile                     # materialized relayout
    plan = 4 * in_tile + 2 * perm_bytes + temp_bytes
    vmem_limit = int(min(max(plan * 5 // 4, 32 << 20), 56 << 20))

    x2 = x.reshape(b, c * h, w)                      # free, contiguous

    x_spec = pl.BlockSpec((pl.Squeezed(), cb * h, w),
                          lambda bi, ci: (bi, ci, 0))
    out_spec = pl.BlockSpec((pl.Squeezed(), s * s, cb * ho, wo),
                            lambda bi, ci: (bi, 0, ci, 0))

    if use_mxu:
        kernel = functools.partial(_contract_mxu_kernel, gain=s,
                                   compute_dtype=compute_dtype,
                                   precision=precision)
        perm = _build_perm(w, s, compute_dtype)
        # Constant index_map -> permutation block is DMA'd once and reused.
        in_specs = [x_spec, pl.BlockSpec((w, w), lambda bi, ci: (0, 0))]
        operands = (x2, perm)
    else:
        kernel = functools.partial(_contract_relayout_kernel, gain=s, h=h)
        in_specs = [x_spec]
        operands = (x2,)

    out = pl.pallas_call(
        kernel,
        out_shape=jax.ShapeDtypeStruct((b, s * s, c * ho, wo), x.dtype),
        grid_spec=pltpu.PrefetchScalarGridSpec(
            num_scalar_prefetch=0,
            grid=(b, c // cb),
            in_specs=in_specs,
            out_specs=out_spec,
        ),
        compiler_params=pltpu.CompilerParams(
            dimension_semantics=("parallel", "parallel"),
            vmem_limit_bytes=vmem_limit,
        ),
    )(*operands)

    # Free, contiguous un-flatten back to the PyTorch output layout.
    return out.reshape(b, c * s * s, ho, wo)


def _contract_ref(x: jax.Array, gain: int = 2) -> jax.Array:
    """Pure-JAX reference mirroring the PyTorch forward exactly."""
    b, c, h, w = x.shape
    s = gain
    y = x.reshape(b, c, h // s, s, w // s, s)
    y = jnp.transpose(y, (0, 3, 5, 1, 2, 4))
    return y.reshape(b, c * s * s, h // s, w // s)


if __name__ == "__main__":
    key = jax.random.PRNGKey(0)
    b, c, h, w = 2, 4, 16, 16
    gain = 2
    x = jax.random.normal(key, (b, c, h, w), dtype=jnp.float32)

    out = contract(x, gain=gain)
    out = jax.block_until_ready(out)

    ref = _contract_ref(x, gain=gain)
    assert out.shape == (b, c * gain * gain, h // gain, w // gain), out.shape
    np.testing.assert_allclose(np.asarray(out), np.asarray(ref), rtol=0, atol=0)

    print("KERNEL_OK")
</pallas_src>

<mosaic_0001>
module attributes {stable_mosaic.version = 11 : i64} {
  func.func @_contract_mxu_kernel(%arg0: i32, %arg1: i32, %arg2: memref<1x64x16xf32, #tpu.memory_space<vmem>>, %arg3: memref<16x16xf32, #tpu.memory_space<vmem>>, %arg4: memref<1x4x32x8xf32, #tpu.memory_space<vmem>>) attributes {dimension_semantics = [#tpu.dimension_semantics<parallel>, #tpu.dimension_semantics<parallel>], iteration_bounds = array<i64: 2, 1>, scalar_prefetch = 0 : i64, scratch_operands = 0 : i64, tpu.core_type = #tpu.core_type<tc>, window_params = [{transform_indices = @transform_0, window_bounds = array<i64: 1, 64, 16>}, {pipeline_mode = #tpu.pipeline_mode<synchronous>, transform_indices = @transform_1, window_bounds = array<i64: 16, 16>}, {transform_indices = @transform_2, window_bounds = array<i64: 1, 4, 32, 8>}]} {
    %c0 = arith.constant 0 : index
    %c0_0 = arith.constant 0 : index
    %0 = vector.load %arg3[%c0, %c0_0] : memref<16x16xf32, #tpu.memory_space<vmem>>, vector<16x16xf32>
    %c0_1 = arith.constant 0 : index
    %c0_2 = arith.constant 0 : index
    %c0_3 = arith.constant 0 : index
    %1 = tpu.strided_load %arg2[%c0_1, %c0_2, %c0_3] {strides = array<i32: 1, 2, 1>} : memref<1x64x16xf32, #tpu.memory_space<vmem>>, vector<1x32x16xf32>
    %2 = vector.shape_cast %1 : vector<1x32x16xf32> to vector<32x16xf32>
    %cst = arith.constant dense<0.000000e+00> : vector<32x16xf32>
    %3 = tpu.matmul %2, %0, %cst {dimension_numbers = #tpu.dot_dimension_numbers<[1], [0], [0], [1], [0, 0, 1, 1], [], []>, precision = #tpu.contract_precision<fp32>} : vector<32x16xf32>, vector<16x16xf32>, vector<32x16xf32> -> vector<32x16xf32>
    %4 = vector.extract_strided_slice %3 {offsets = [0, 0], sizes = [32, 8], strides = [1, 1]} : vector<32x16xf32> to vector<32x8xf32>
    %c0_4 = arith.constant 0 : index
    %c0_5 = arith.constant 0 : index
    %c0_6 = arith.constant 0 : index
    %c0_7 = arith.constant 0 : index
    %5 = vector.load %arg4[%c0_4, %c0_5, %c0_6, %c0_7] : memref<1x4x32x8xf32, #tpu.memory_space<vmem>>, vector<1x1x32x8xf32>
    %6 = vector.shape_cast %5 : vector<1x1x32x8xf32> to vector<32x8xf32>
    %7 = vector.shape_cast %4 : vector<32x8xf32> to vector<1x1x32x8xf32>
    tpu.vector_store %arg4[%c0_4, %c0_5, %c0_6, %c0_7], %7 {strides = array<i32>} : memref<1x4x32x8xf32, #tpu.memory_space<vmem>>, vector<1x1x32x8xf32>,
    %8 = vector.extract_strided_slice %3 {offsets = [0, 8], sizes = [32, 8], strides = [1, 1]} : vector<32x16xf32> to vector<32x8xf32>
    %c0_8 = arith.constant 0 : index
    %c1 = arith.constant 1 : index
    %c0_9 = arith.constant 0 : index
    %c0_10 = arith.constant 0 : index
    %9 = vector.load %arg4[%c0_8, %c1, %c0_9, %c0_10] : memref<1x4x32x8xf32, #tpu.memory_space<vmem>>, vector<1x1x32x8xf32>
    %10 = vector.shape_cast %9 : vector<1x1x32x8xf32> to vector<32x8xf32>
    %11 = vector.shape_cast %8 : vector<32x8xf32> to vector<1x1x32x8xf32>
    tpu.vector_store %arg4[%c0_8, %c1, %c0_9, %c0_10], %11 {strides = array<i32>} : memref<1x4x32x8xf32, #tpu.memory_space<vmem>>, vector<1x1x32x8xf32>,
    %c0_11 = arith.constant 0 : index
    %c1_12 = arith.constant 1 : index
    %c0_13 = arith.constant 0 : index
    %12 = tpu.strided_load %arg2[%c0_11, %c1_12, %c0_13] {strides = array<i32: 1, 2, 1>} : memref<1x64x16xf32, #tpu.memory_space<vmem>>, vector<1x32x16xf32>
    %13 = vector.shape_cast %12 : vector<1x32x16xf32> to vector<32x16xf32>
    %cst_14 = arith.constant dense<0.000000e+00> : vector<32x16xf32>
    %14 = tpu.matmul %13, %0, %cst_14 {dimension_numbers = #tpu.dot_dimension_numbers<[1], [0], [0], [1], [0, 0, 1, 1], [], []>, precision = #tpu.contract_precision<fp32>} : vector<32x16xf32>, vector<16x16xf32>, vector<32x16xf32> -> vector<32x16xf32>
    %15 = vector.extract_strided_slice %14 {offsets = [0, 0], sizes = [32, 8], strides = [1, 1]} : vector<32x16xf32> to vector<32x8xf32>
    %c0_15 = arith.constant 0 : index
    %c2 = arith.constant 2 : index
    %c0_16 = arith.constant 0 : index
    %c0_17 = arith.constant 0 : index
    %16 = vector.load %arg4[%c0_15, %c2, %c0_16, %c0_17] : memref<1x4x32x8xf32, #tpu.memory_space<vmem>>, vector<1x1x32x8xf32>
    %17 = vector.shape_cast %16 : vector<1x1x32x8xf32> to vector<32x8xf32>
    %18 = vector.shape_cast %15 : vector<32x8xf32> to vector<1x1x32x8xf32>
    tpu.vector_store %arg4[%c0_15, %c2, %c0_16, %c0_17], %18 {strides = array<i32>} : memref<1x4x32x8xf32, #tpu.memory_space<vmem>>, vector<1x1x32x8xf32>,
    %19 = vector.extract_strided_slice %14 {offsets = [0, 8], sizes = [32, 8], strides = [1, 1]} : vector<32x16xf32> to vector<32x8xf32>
    %c0_18 = arith.constant 0 : index
    %c3 = arith.constant 3 : index
    %c0_19 = arith.constant 0 : index
    %c0_20 = arith.constant 0 : index
    %20 = vector.load %arg4[%c0_18, %c3, %c0_19, %c0_20] : memref<1x4x32x8xf32, #tpu.memory_space<vmem>>, vector<1x1x32x8xf32>
    %21 = vector.shape_cast %20 : vector<1x1x32x8xf32> to vector<32x8xf32>
    %22 = vector.shape_cast %19 : vector<32x8xf32> to vector<1x1x32x8xf32>
    tpu.vector_store %arg4[%c0_18, %c3, %c0_19, %c0_20], %22 {strides = array<i32>} : memref<1x4x32x8xf32, #tpu.memory_space<vmem>>, vector<1x1x32x8xf32>,
    return
  }
  func.func @transform_0(%arg0: i32, %arg1: i32) -> (i32, i32, i32) {
    %c0_i32 = arith.constant 0 : i32
    %c0_i32_0 = arith.constant 0 : i32
    return %arg0, %arg1, %c0_i32 : i32, i32, i32
  }
  func.func @transform_1(%arg0: i32, %arg1: i32) -> (i32, i32) {
    %c0_i32 = arith.constant 0 : i32
    %c0_i32_0 = arith.constant 0 : i32
    %c0_i32_1 = arith.constant 0 : i32
    return %c0_i32, %c0_i32_0 : i32, i32
  }
  func.func @transform_2(%arg0: i32, %arg1: i32) -> (i32, i32, i32, i32) {
    %c0_i32 = arith.constant 0 : i32
    %c0_i32_0 = arith.constant 0 : i32
    %c0_i32_1 = arith.constant 0 : i32
    return %arg0, %c0_i32, %arg1, %c0_i32_0 : i32, i32, i32, i32
  }
}

</mosaic_0001>

<bundles_post_ra>
// kernel: tpu_custom_call.1
= control target key start
LH: loop header
LB: loop body
LE: loop exit
PB: predicated region body
PF: predicated region fallthrough
CT: control target
= control target key end

     0   :  { %s1829_s9 = smov 0   ;;  %s1831_s10 = smov 0   ;;  %s2052_s0 = inlined_call_operand.vmem [shape: f32[2,64,16], index: 0, kind: input, shape index: {}]   ;;  %s2053_s1 = inlined_call_operand.vmem [shape: f32[16,16], index: 1, kind: input, shape index: {}]   ;;  %s2054_s2 = inlined_call_operand.vmem [shape: f32[2,4,32,8], index: 2, kind: output, shape index: {}]  }
   0x1   :  { %s1833_s11 = smov 0  }
   0x2 LB: > { %s24_s12 = sadd.s32 1, %s1807_s10  ;;  %p1544_p0 = scmp.ge.s32.totalorder %s1811_s11, 1  ;;  %s1811_s11 = sphi %s1833_s11, %s12_s11   ;;  %s1807_s10 = sphi %s1831_s10, %s2056_s10   ;;  %s1803_s9 = sphi %s1829_s9, %s2055_s9  }
   0x3   : > { %p26_p1 = scmp.ge.s32.totalorder %s24_s12, 2  ;;  %p133_p2 = scmp.lt.s32.totalorder %s1811_s11, 3 }
   0x5   : > { %s2058_s12 = smov (%p26_p1, %s24_s12), 0  ;;  %p134_p3 = pnand %p1544_p0, %p133_p2 }
   0x6   : > { %p164_p4 = scmp.lt.s32.totalorder (!%p134_p3), %s1803_s9, 1  ;;  %s1813_s25 = smov (!%p134_p3), 120  }
   0x7   : > { %137 = sbr.rel (%p134_p3) target bundleno = 390 (0x186), region = 28 }
   0xc   : > { %v184_v0 = vld [vmem:[%s2053_s1 + $0x8] sm:$0xff]  ;;  %v183_v1 = vld [vmem:[%s2053_s1] sm:$0xff]  ;;  %s2060_s9 = smov (!%p164_p4, %s1803_s9), 1  ;;  %vm192_vm0 = vcmask 130048   ;;  %vm793_vm1 = vcmask 64512  }
   0xd   : > { %v1853_v2 = vand.u32 4294901760, %v184_v0  ;;  %v1855_v3 = vand.u32 4294901760, %v183_v1  ;;  %s1570_s17 = sshll.u32 %s2060_s9, 6  ;;  %s1571_s21 = sshll.u32 %s2060_s9, 7 }
   0xe   : > { %s1878_s20 = scalar_lea.vmem %s2052_s0, %s1570_s17  ;;  %s2001_s24 = scalar_lea.vmem %s2054_s2, %s1571_s21 }
   0xf   : > { %1644 = vmatprep.subr.mxu0 %v1853_v2  ;;  %v1861_v4 = vsub.f32 %v184_v0, %v1853_v2  ;;  %v1864_v5 = vsub.f32 %v183_v1, %v1855_v3  ;;  %v185_v8 = vld [vmem:[%s1878_s20] ss:$2 sm:$0xff]  ;;  %v1549_v9 = vld [vmem:[%s1878_s20 + $0x10] ss:$2 sm:$0xff]  ;;  %v1556_v34 = vld [vmem:[%s1878_s20 + $0x1] ss:$2 sm:$0xff] }
  0x10   : > { %1645 = vmatpush3.msra.mxu0 %v1853_v2  ;;  %v1550_v10 = vld [vmem:[%s1878_s20 + $0x20] ss:$2 sm:$0xff]  ;;  %v194_v13 = vsel %vm192_vm0, %v185_v8, 0  ;;  %v197_v14 = vsel %vm192_vm0, %v1549_v9, 0  ;;  %v1551_v15 = vld [vmem:[%s1878_s20 + $0x30] ss:$2 sm:$0xff] }
  0x11   : > { %v1869_v6 = vand.u32 4294901760, %v1861_v4  ;;  %1646 = vmatprep.subr.mxu0 %v1855_v3  ;;  %v1873_v7 = vand.u32 4294901760, %v1864_v5  ;;  %v1892_v16 = vand.u32 4294901760, %v194_v13  ;;  %v1894_v17 = vand.u32 4294901760, %v197_v14  ;;  %v1557_v41 = vld [vmem:[%s1878_s20 + $0x11] ss:$2 sm:$0xff] }
  0x12   : > { %1647 = vmatpush3.msra.mxu0 %v1855_v3  ;;  %v200_v18 = vsel %vm192_vm0, %v1550_v10, 0  ;;  %v203_v19 = vsel %vm192_vm0, %v1551_v15, 0  ;;  %v828_v40 = vsel %vm192_vm0, %v1556_v34, 0  ;;  %v1558_v42 = vld [vmem:[%s1878_s20 + $0x21] ss:$2 sm:$0xff]  ;;  %v831_v45 = vsel %vm192_vm0, %v1557_v41, 0 }
  0x13   : > { %v344_v11 = vsub.f32 %v1861_v4, %v1869_v6  ;;  %v351_v12 = vsub.f32 %v1864_v5, %v1873_v7  ;;  %1664 = vmatprep.subr.mxu0 %v1861_v4  ;;  %v1902_v22 = vand.u32 4294901760, %v200_v18  ;;  %v1904_v23 = vand.u32 4294901760, %v203_v19  ;;  %1658 = vmatprep.mubr.f32.mxu1 %v1892_v16  ;;  %v1559_v47 = vld [vmem:[%s1878_s20 + $0x31] ss:$2 sm:$0xff] }
  0x14   : > { %v273_v24 = vsub.f32 %v194_v13, %v1892_v16  ;;  %v283_v25 = vsub.f32 %v197_v14, %v1894_v17  ;;  %v1927_v44 = vand.u32 4294901760, %v828_v40  ;;  %v834_v46 = vsel %vm192_vm0, %v1558_v42, 0 }
  0x15   : > { %v1898_v20 = vand.u32 4294901760, %v344_v11  ;;  %v1900_v21 = vand.u32 4294901760, %v351_v12  ;;  %v293_v26 = vsub.f32 %v200_v18, %v1902_v22  ;;  %v303_v27 = vsub.f32 %v203_v19, %v1904_v23 }
  0x16   : > { %v274_v28 = vand.u32 4294901760, %v273_v24  ;;  %v284_v29 = vand.u32 4294901760, %v283_v25  ;;  %v1936_v48 = vand.u32 4294901760, %v831_v45  ;;  %v907_v49 = vsub.f32 %v828_v40, %v1927_v44 }
  0x17   : > { %1654 = vmatprep.subr.mxu1 %v1898_v20  ;;  %v294_v30 = vand.u32 4294901760, %v293_v26  ;;  %v304_v31 = vand.u32 4294901760, %v303_v27  ;;  %v1939_v50 = vand.u32 4294901760, %v834_v46  ;;  %v837_v51 = vsel %vm192_vm0, %v1559_v47, 0 }
  0x18   : > { %1655 = vmatpush3.msra.mxu1 %v1898_v20  ;;  %v275_v32 = vsub.f32 %v273_v24, %v274_v28  ;;  %v285_v33 = vsub.f32 %v283_v25, %v284_v29  ;;  %v917_v52 = vsub.f32 %v831_v45, %v1936_v48  ;;  %v1946_v53 = vand.u32 4294901760, %v837_v51 }
  0x19   : > { %1656 = vmatprep.subr.mxu1 %v1900_v21  ;;  %v295_v35 = vsub.f32 %v293_v26, %v294_v30  ;;  %v305_v36 = vsub.f32 %v303_v27, %v304_v31  ;;  %v908_v54 = vand.u32 4294901760, %v907_v49  ;;  %v927_v55 = vsub.f32 %v834_v46, %v1939_v50 }
  0x1a   : > { %1657 = vmatpush3.msra.mxu1 %v1900_v21  ;;  %v276_v37 = vand.u32 4294901760, %v275_v32  ;;  %v286_v38 = vand.u32 4294901760, %v285_v33  ;;  %v918_v56 = vand.u32 4294901760, %v917_v52  ;;  %v937_v57 = vsub.f32 %v837_v51, %v1946_v53 }
  0x1b   : > { %1659 = vmatmul.mubr.f32.vlgmr.msra.gmra.mxu1 %v1894_v17  ;;  %1674 = vmatprep.subr.mxu1 %v1853_v2  ;;  %v296_v39 = vand.u32 4294901760, %v295_v35  ;;  %v306_v43 = vand.u32 4294901760, %v305_v36  ;;  %v909_v58 = vsub.f32 %v907_v49, %v908_v54  ;;  %v928_v59 = vand.u32 4294901760, %v927_v55 }
  0x1c   : > { %1675 = vmatpush3.msra.mxu1 %v1853_v2  ;;  %1661 = vmatprep.mubr.f32.mxu1 %v1902_v22  ;;  %v919_v60 = vsub.f32 %v917_v52, %v918_v56  ;;  %v938_v61 = vand.u32 4294901760, %v937_v57 }
  0x1d   : > { %1676 = vmatprep.subr.mxu1 %v1855_v3  ;;  %1648 = vmatprep.mubr.f32.mxu0 %v276_v37  ;;  %v910_v62 = vand.u32 4294901760, %v909_v58  ;;  %v929_v63 = vsub.f32 %v927_v55, %v928_v59 }
  0x1e   : > { %1677 = vmatpush3.msra.mxu1 %v1855_v3  ;;  %1649 = vmatmul.mubr.f32.vlgmr.msra.gmra.mxu0 %v286_v38  ;;  %v920_v0 = vand.u32 4294901760, %v919_v60  ;;  %v939_v1 = vsub.f32 %v937_v57, %v938_v61 }
  0x1f   : > { %1662 = vmatmul.mubr.f32.gmra.mxu1 %v1904_v23  ;;  %1665 = vmatpush3.msra.mxu0 %v1861_v4  ;;  %v930_v8 = vand.u32 4294901760, %v929_v63 }
  0x20   : > { %1651 = vmatprep.mubr.f32.mxu0 %v296_v39  ;;  %1666 = vmatprep.subr.mxu0 %v1864_v5  ;;  %v940_v9 = vand.u32 4294901760, %v939_v1 }
  0x21   : > { %1678 = vmatprep.mubr.f32.mxu1 %v274_v28  ;;  %1667 = vmatpush3.msra.mxu0 %v1864_v5 }
  0x22   : > { %1694 = vmatprep.subr.mxu1 %v1853_v2  ;;  %1652 = vmatmul.mubr.f32.gmra.mxu0 %v306_v43 }
  0x23   : > { %1684 = vmatprep.subr.mxu0 %v1869_v6  ;;  %1668 = vmatprep.mubr.f32.mxu0 %v273_v24 }
  0x24   : > { %1679 = vmatmul.mubr.f32.vlgmr.msra.gmra.mxu1 %v284_v29 }
  0x25   : > { %1695 = vmatpush3.msra.mxu1 %v1853_v2  ;;  %1681 = vmatprep.mubr.f32.mxu1 %v294_v30 }
  0x26   : > { %1696 = vmatprep.subr.mxu1 %v1855_v3  ;;  %1669 = vmatmul.mubr.f32.vlgmr.msra.gmra.mxu0 %v283_v25 }
  0x27   : > { %1697 = vmatpush3.msra.mxu1 %v1855_v3  ;;  %1685 = vmatpush3.msra.mxu0 %v1869_v6 }
  0x28   : > { %1671 = vmatprep.mubr.f32.mxu0 %v293_v26  ;;  %1686 = vmatprep.subr.mxu0 %v1873_v7 }
  0x29   : > { %1682 = vmatmul.mubr.f32.gmra.mxu1 %v304_v31  ;;  %1687 = vmatpush3.msra.mxu0 %v1873_v7 }
  0x2a   : > { %1698 = vmatprep.mubr.f32.mxu1 %v1892_v16  ;;  %1672 = vmatmul.mubr.f32.gmra.mxu0 %v303_v27 }
  0x2b   : > { %1704 = vmatprep.subr.mxu0 %v1853_v2  ;;  %1688 = vmatprep.mubr.f32.mxu0 %v1892_v16 }
  0x2c   : > { %1714 = vmatprep.subr.mxu1 %v1898_v20 }
  0x2d   : > { %1699 = vmatmul.mubr.f32.vlgmr.msra.gmra.mxu1 %v1894_v17 }
  0x2e   : > { %1715 = vmatpush3.msra.mxu1 %v1898_v20  ;;  %1701 = vmatprep.mubr.f32.mxu1 %v1902_v22 }
  0x2f   : > { %1689 = vmatmul.mubr.f32.vlgmr.msra.gmra.mxu0 %v1894_v17  ;;  %1716 = vmatprep.subr.mxu1 %v1900_v21 }
  0x30   : > { %1705 = vmatpush3.msra.mxu0 %v1853_v2  ;;  %1691 = vmatprep.mubr.f32.mxu0 %v1902_v22 }
  0x31   : > { %1706 = vmatprep.subr.mxu0 %v1855_v3  ;;  %1702 = vmatmul.mubr.f32.gmra.mxu1 %v1904_v23 }
  0x32   : > { %1707 = vmatpush3.msra.mxu0 %v1855_v3  ;;  %1717 = vmatpush3.msra.mxu1 %v1900_v21 }
  0x33   : > { %1692 = vmatmul.mubr.f32.gmra.mxu0 %v1904_v23  ;;  %1718 = vmatprep.mubr.f32.mxu1 %v1927_v44 }
  0x34   : > { %1708 = vmatprep.mubr.f32.mxu0 %v910_v62  ;;  %1724 = vmatprep.subr.mxu0 %v1861_v4 }
  0x35   : > { %1719 = vmatmul.mubr.f32.vlgmr.msra.gmra.mxu1 %v1936_v48  ;;  %1734 = vmatprep.subr.mxu1 %v1853_v2 }
  0x36   : > { %1735 = vmatpush3.msra.mxu1 %v1853_v2  ;;  %1721 = vmatprep.mubr.f32.mxu1 %v1939_v50 }
  0x37   : > { %1709 = vmatmul.mubr.f32.vlgmr.msra.gmra.mxu0 %v920_v0  ;;  %1736 = vmatprep.subr.mxu1 %v1855_v3 }
  0x38   : > { %1725 = vmatpush3.msra.mxu0 %v1861_v4  ;;  %1711 = vmatprep.mubr.f32.mxu0 %v930_v8 }
  0x39   : > { %1726 = vmatprep.subr.mxu0 %v1864_v5  ;;  %1722 = vmatmul.mubr.f32.gmra.mxu1 %v1946_v53 }
  0x3a   : > { %1727 = vmatpush3.msra.mxu0 %v1864_v5  ;;  %1737 = vmatpush3.msra.mxu1 %v1855_v3 }
  0x3b   : > { %1712 = vmatmul.mubr.f32.gmra.mxu0 %v940_v9  ;;  %1738 = vmatprep.mubr.f32.mxu1 %v908_v54 }
  0x3c   : > { %1728 = vmatprep.mubr.f32.mxu0 %v907_v49  ;;  %1744 = vmatprep.subr.mxu0 %v1869_v6 }
  0x3d   : > { %1739 = vmatmul.mubr.f32.vlgmr.msra.gmra.mxu1 %v918_v56  ;;  %1754 = vmatprep.subr.mxu1 %v1853_v2 }
  0x3e   : > { %1755 = vmatpush3.msra.mxu1 %v1853_v2  ;;  %1741 = vmatprep.mubr.f32.mxu1 %v928_v59 }
  0x3f   : > { %1729 = vmatmul.mubr.f32.vlgmr.msra.gmra.mxu0 %v917_v52  ;;  %1756 = vmatprep.subr.mxu1 %v1855_v3 }
  0x40   : > { %1745 = vmatpush3.msra.mxu0 %v1869_v6  ;;  %1731 = vmatprep.mubr.f32.mxu0 %v927_v55 }
  0x41   : > { %1746 = vmatprep.subr.mxu0 %v1873_v7  ;;  %1742 = vmatmul.mubr.f32.gmra.mxu1 %v938_v61 }
  0x42   : > { %1747 = vmatpush3.msra.mxu0 %v1873_v7  ;;  %1757 = vmatpush3.msra.mxu1 %v1855_v3 }
  0x43   : > { %1732 = vmatmul.mubr.f32.gmra.mxu0 %v937_v57  ;;  %1758 = vmatprep.mubr.f32.mxu1 %v1927_v44 }
  0x44   : > { %1748 = vmatprep.mubr.f32.mxu0 %v1927_v44 }
  0x45   : > { %1759 = vmatmul.mubr.f32.vlgmr.msra.gmra.mxu1 %v1936_v48 }
  0x46   : > { %1761 = vmatprep.mubr.f32.mxu1 %v1939_v50 }
  0x47   : > { %1749 = vmatmul.mubr.f32.vlgmr.msra.gmra.mxu0 %v1936_v48 }
  0x48   : > { %1751 = vmatprep.mubr.f32.mxu0 %v1939_v50 }
  0x49   : > { %1762 = vmatmul.mubr.f32.gmra.mxu1 %v1946_v53 }
  0x4b   : > { %1752 = vmatmul.mubr.f32.gmra.mxu0 %v1946_v53 }
  0xdb   : > { %v1660_v2 = vpop.f32.mrf.mxu1 }
  0xdd   : > { %v389_v4 = vpop.f32.mrf.mxu1 }
  0xde   : > { %v1650_v3 = vpop.f32.mrf.mxu0 }
  0xdf   : > { %v1663_v5 = vpop.f32.mrf.mxu1  ;;  %v396_v15 = vadd.f32 %v1660_v2, %v1650_v3 }
  0xe0   : > { %v278_v6 = vpop.f32.mrf.mxu0 }
  0xe1   : > { %v401_v7 = vpop.f32.mrf.mxu1  ;;  %v390_v18 = vadd.f32 %v389_v4, %v278_v6 }
  0xe2   : > { %v1653_v10 = vpop.f32.mrf.mxu0 }
  0xe3   : > { %v408_v22 = vadd.f32 %v1663_v5, %v1653_v10 }
  0xe4   : > { %v1680_v11 = vpop.f32.mrf.mxu1  ;;  %v298_v12 = vpop.f32.mrf.mxu0 }
  0xe5   : > { %v402_v26 = vadd.f32 %v401_v7, %v298_v12 }
  0xe6   : > { %v579_v13 = vpop.f32.mrf.mxu1  ;;  %v1670_v14 = vpop.f32.mrf.mxu0 }
  0xe7   : > { %v491_v19 = vadd.f32 %v1670_v14, %v396_v15 }
  0xe8   : > { %v483_v16 = vpop.f32.mrf.mxu0 }
  0xe9   : > { %v1683_v17 = vpop.f32.mrf.mxu1  ;;  %v484_v23 = vadd.f32 %v483_v16, %v390_v18  ;;  %v588_v27 = vadd.f32 %v1680_v11, %v491_v19 }
  0xea   : > { %v1673_v20 = vpop.f32.mrf.mxu0 }
  0xeb   : > { %v595_v21 = vpop.f32.mrf.mxu1  ;;  %v505_v28 = vadd.f32 %v1673_v20, %v408_v22  ;;  %v580_v31 = vadd.f32 %v579_v13, %v484_v23 }
  0xec   : > { %v497_v24 = vpop.f32.mrf.mxu0 }
  0xed   : > { %v1700_v25 = vpop.f32.mrf.mxu1  ;;  %v498_v32 = vadd.f32 %v497_v24, %v402_v26  ;;  %v604_v36 = vadd.f32 %v1683_v17, %v505_v28 }
  0xef   : > { %v1690_v29 = vpop.f32.mrf.mxu0  ;;  %v771_v30 = vpop.f32.mrf.mxu1  ;;  %v596_v41 = vadd.f32 %v595_v21, %v498_v32 }
  0xf0   : > { %v687_v33 = vadd.f32 %v1690_v29, %v588_v27 }
  0xf1   : > { %v680_v34 = vpop.f32.mrf.mxu0  ;;  %v1703_v35 = vpop.f32.mrf.mxu1 }
  0xf2   : > { %v778_v37 = vadd.f32 %v1700_v25, %v687_v33  ;;  %v681_v38 = vadd.f32 %v680_v34, %v580_v31 }
  0xf3   : > { %v1693_v39 = vpop.f32.mrf.mxu0  ;;  %v783_v40 = vpop.f32.mrf.mxu1 }
  0xf4   : > { %795 = vst.msk [vmem:[%s2001_s24 + $0x8] sm:$0xff] %vm793_vm1, %v778_v37  ;;  %v772_v42 = vadd.f32 %v771_v30, %v681_v38  ;;  %v699_v43 = vadd.f32 %v1693_v39, %v604_v36  ;;  %804 = vrot.lane.b32.xlu0 %v778_v37, %s1813_s25 }
  0xf5   : > { %v692_v44 = vpop.f32.mrf.mxu0  ;;  %v1720_v45 = vpop.f32.mrf.mxu1 }
  0xf6   : > { %794 = vst.msk [vmem:[%s2001_s24] sm:$0xff] %vm793_vm1, %v772_v42  ;;  %v790_v46 = vadd.f32 %v1703_v35, %v699_v43  ;;  %v693_v47 = vadd.f32 %v692_v44, %v596_v41 }
  0xf7   : > { %v1710_v48 = vpop.f32.mrf.mxu0  ;;  %v1023_v49 = vpop.f32.mrf.mxu1 }
  0xf8   : > { %797 = vst.msk [vmem:[%s2001_s24 + $0x18] sm:$0xff] %vm793_vm1, %v790_v46  ;;  %v784_v50 = vadd.f32 %v783_v40, %v693_v47  ;;  %808 = vrot.lane.b32.xlu1 %v790_v46, %s1813_s25  ;;  %802 = vrot.lane.b32.xlu0 %v772_v42, %s1813_s25  ;;  %v1030_v59 = vadd.f32 %v1720_v45, %v1710_v48 }
  0xf9   : > { %v912_v51 = vpop.f32.mrf.mxu0  ;;  %v1723_v52 = vpop.f32.mrf.mxu1 }
  0xfa   : > { %796 = vst.msk [vmem:[%s2001_s24 + $0x10] sm:$0xff] %vm793_vm1, %v784_v50  ;;  %v1024_v62 = vadd.f32 %v1023_v49, %v912_v51 }
  0xfb   : > { %v1713_v53 = vpop.f32.mrf.mxu0  ;;  %v1035_v54 = vpop.f32.mrf.mxu1 }
  0xfc   : > { %806 = vrot.lane.b32.xlu1 %v784_v50, %s1813_s25  ;;  %v1042_v8 = vadd.f32 %v1723_v52, %v1713_v53 }
  0xfd   : > { %v932_v55 = vpop.f32.mrf.mxu0  ;;  %v1740_v56 = vpop.f32.mrf.mxu1 }
  0xfe   : > { %v1036_v3 = vadd.f32 %v1035_v54, %v932_v55 }
  0xff   : > { %v1730_v57 = vpop.f32.mrf.mxu0  ;;  %v1213_v58 = vpop.f32.mrf.mxu1 }
 0x100   : > { %v1125_v63 = vadd.f32 %v1730_v57, %v1030_v59 }
 0x101   : > { %v1117_v60 = vpop.f32.mrf.mxu0  ;;  %v1743_v61 = vpop.f32.mrf.mxu1 }
 0x102   : > { %v1118_v9 = vadd.f32 %v1117_v60, %v1024_v62  ;;  %v1222_v5 = vadd.f32 %v1740_v56, %v1125_v63 }
 0x103   : > { %v1733_v0 = vpop.f32.mrf.mxu0  ;;  %v1229_v1 = vpop.f32.mrf.mxu1 }
 0x104   : > { %v1139_v6 = vadd.f32 %v1733_v0, %v1042_v8  ;;  %v1214_v11 = vadd.f32 %v1213_v58, %v1118_v9 }
 0x105   : > { %v1131_v2 = vpop.f32.mrf.mxu0  ;;  %v1760_v4 = vpop.f32.mrf.mxu1 }
 0x106   : > { %v1132_v12 = vadd.f32 %v1131_v2, %v1036_v3  ;;  %v1238_v15 = vadd.f32 %v1743_v61, %v1139_v6 }
 0x107   : > { %v1750_v7 = vpop.f32.mrf.mxu0  ;;  %v1405_v10 = vpop.f32.mrf.mxu1 }
 0x108   : > { %v1321_v13 = vadd.f32 %v1750_v7, %v1222_v5  ;;  %v1230_v20 = vadd.f32 %v1229_v1, %v1132_v12 }
 0x109   : > { %v1314_v14 = vpop.f32.mrf.mxu0  ;;  %v1763_v19 = vpop.f32.mrf.mxu1 }
 0x10a   : > { %v1412_v16 = vadd.f32 %v1760_v4, %v1321_v13  ;;  %v1315_v17 = vadd.f32 %v1314_v14, %v1214_v11 }
 0x10b   : > { %v1753_v18 = vpop.f32.mrf.mxu0  ;;  %v1417_v26 = vpop.f32.mrf.mxu1 }
 0x10c   : > { %1561 = vst.msk [vmem:[%s2001_s24 + $0x48] sm:$0xff] %vm793_vm1, %v1412_v16  ;;  %v1406_v21 = vadd.f32 %v1405_v10, %v1315_v17  ;;  %v1333_v22 = vadd.f32 %v1753_v18, %v1238_v15  ;;  %1438 = vrot.lane.b32.xlu1 %v1412_v16, %s1813_s25 }
 0x10d   : > { %v1326_v23 = vpop.f32.mrf.mxu0 }
 0x10e   : > { %1560 = vst.msk [vmem:[%s2001_s24 + $0x40] sm:$0xff] %vm793_vm1, %v1406_v21  ;;  %v1424_v24 = vadd.f32 %v1763_v19, %v1333_v22  ;;  %v1327_v25 = vadd.f32 %v1326_v23, %v1230_v20  ;;  %1436 = vrot.lane.b32.xlu0 %v1406_v21, %s1813_s25 }
 0x110   : > { %1563 = vst.msk [vmem:[%s2001_s24 + $0x58] sm:$0xff] %vm793_vm1, %v1424_v24  ;;  %v1418_v27 = vadd.f32 %v1417_v26, %v1327_v25  ;;  %1442 = vrot.lane.b32.xlu1 %v1424_v24, %s1813_s25 }
 0x112   : > { %1562 = vst.msk [vmem:[%s2001_s24 + $0x50] sm:$0xff] %vm793_vm1, %v1418_v27  ;;  %1440 = vrot.lane.b32.xlu0 %v1418_v27, %s1813_s25 }
 0x166   : > { %v805_v28 = vpop.permute.xlu0 %804 }
 0x167   : > { %1553 = vst.msk [vmem:[%s2001_s24 + $0x28] sm:$0xff] %vm793_vm1, %v805_v28 }
 0x16a   : > { %v809_v29 = vpop.permute.xlu1 %808  ;;  %v803_v30 = vpop.permute.xlu0 %802 }
 0x16b   : > { %1555 = vst.msk [vmem:[%s2001_s24 + $0x38] sm:$0xff] %vm793_vm1, %v809_v29  ;;  %1552 = vst.msk [vmem:[%s2001_s24 + $0x20] sm:$0xff] %vm793_vm1, %v803_v30 }
 0x16e   : > { %v807_v31 = vpop.permute.xlu1 %806 }
 0x16f   : > { %1554 = vst.msk [vmem:[%s2001_s24 + $0x30] sm:$0xff] %vm793_vm1, %v807_v31 }
 0x17e   : > { %v1439_v32 = vpop.permute.xlu1 %1438 }
 0x17f   : > { %1565 = vst.msk [vmem:[%s2001_s24 + $0x68] sm:$0xff] %vm793_vm1, %v1439_v32 }
 0x180   : > { %v1437_v33 = vpop.permute.xlu0 %1436 }
 0x181   : > { %1564 = vst.msk [vmem:[%s2001_s24 + $0x60] sm:$0xff] %vm793_vm1, %v1437_v33 }
 0x182   : > { %v1443_v34 = vpop.permute.xlu1 %1442 }
 0x183   : > { %1567 = vst.msk [vmem:[%s2001_s24 + $0x78] sm:$0xff] %vm793_vm1, %v1443_v34 }
 0x184   : > { %v1441_v35 = vpop.permute.xlu0 %1440 }
 0x185   : > { %1566 = vst.msk [vmem:[%s2001_s24 + $0x70] sm:$0xff] %vm793_vm1, %v1441_v35 }
 0x186 PF: > { %s12_s11 = sadd.s32 1, %s1811_s11   ;;  %s2055_s9 = smov %s1807_s10 }
 0x187   : > { %p9_p5 = scmp.ge.s32.totalorder %s12_s11, 4   ;;  %s2056_s10 = smov %s2058_s12 }
 0x189   :  { %11 = sbr.rel (!%p9_p5) target bundleno = 2 (0x2), region = 68 }

</bundles_post_ra>
